<compile_context>
chip_gen: v6e
topology: v6e:2x2x1
jax: 0.10.0
libtpu: 0.0.40
codegen_flags: <defaults>
</compile_context>

<pallas_src>
import jax
import jax.numpy as jnp
from jax.experimental import pallas as pl
from jax.experimental.pallas import tpu as pltpu

_CHUNKED_DMA_MIN_BYTES = 64 * 1024 * 1024  # chunk HBM->HBM copies >= 64 MiB
_MAX_DMA_CHUNKS = 8                        # outstanding DMA descriptors


def _single_dma_copy_kernel(x_ref, o_ref, sem):
    # One HBM->HBM DMA for the whole array; no VMEM round trip.
    cp = pltpu.make_async_copy(x_ref, o_ref, sem)
    cp.start()
    cp.wait()


def _make_chunked_dma_copy_kernel(bounds):
    # `bounds` is a static tuple of (lo, hi) slices along the leading axis.
    # Start every DMA first (multiple outstanding descriptors), then wait all.
    def kernel(x_ref, o_ref, sems):
        copies = []
        for i, (lo, hi) in enumerate(bounds):
            cp = pltpu.make_async_copy(x_ref.at[lo:hi], o_ref.at[lo:hi], sems.at[i])
            cp.start()
            copies.append(cp)
        for cp in copies:
            cp.wait()

    return kernel


def _pallas_dma_copy(x: jax.Array) -> jax.Array:
    """Physical copy of `x` via HBM->HBM DMA(s) inside a Pallas kernel."""
    nbytes = x.size * x.dtype.itemsize
    leading = x.shape[0]

    n_chunks = 1
    if nbytes >= _CHUNKED_DMA_MIN_BYTES and leading >= 2:
        n_chunks = min(_MAX_DMA_CHUNKS, leading)

    if n_chunks == 1:
        kernel = _single_dma_copy_kernel
        scratch = [pltpu.SemaphoreType.DMA(())]
    else:
        # Static, roughly even chunk boundaries along the leading axis.
        base, rem = divmod(leading, n_chunks)
        bounds = []
        lo = 0
        for i in range(n_chunks):
            hi = lo + base + (1 if i < rem else 0)
            bounds.append((lo, hi))
            lo = hi
        kernel = _make_chunked_dma_copy_kernel(tuple(bounds))
        scratch = [pltpu.SemaphoreType.DMA((n_chunks,))]

    return pl.pallas_call(
        kernel,
        out_shape=jax.ShapeDtypeStruct(x.shape, x.dtype),
        in_specs=[pl.BlockSpec(memory_space=pl.ANY)],
        out_specs=pl.BlockSpec(memory_space=pl.ANY),
        scratch_shapes=scratch,
        cost_estimate=pl.CostEstimate(
            flops=0, transcendentals=0, bytes_accessed=2 * nbytes
        ),
    )(x)


def identity(x: jax.Array, *, copy: bool = False,
             min_pallas_copy_bytes: int = 1 << 20) -> jax.Array:
    """Identity forward pass (matches torch `Identity.forward(x) -> x`).

    Default: returns `x` unchanged — a true no-op (nothing emitted).
    `copy=True`: returns a physically distinct buffer. Small arrays use XLA's
    native copy; arrays >= `min_pallas_copy_bytes` use the Pallas HBM->HBM
    DMA kernel (chunked into multiple outstanding DMAs when very large).
    """
    if not copy:
        # Highest-value optimization: identity is a literal no-op.
        return x

    # Degenerate shapes (0-d or zero-sized): no DMA, just a trivial copy.
    if x.ndim == 0 or x.size == 0:
        return jnp.copy(x)

    nbytes = x.size * x.dtype.itemsize
    if nbytes < min_pallas_copy_bytes:
        # Custom-call launch overhead dominates at small sizes; let XLA copy.
        return jnp.copy(x)

    return _pallas_dma_copy(x)


if __name__ == "__main__":
    key = jax.random.PRNGKey(0)
    # NCHW-style input consistent with the CocoObjectDetection usage.
    x = jax.random.normal(key, (2, 4, 16, 16), dtype=jnp.float32)

    # Default path: Identity.forward(x) -> x, literal no-op.
    y = identity(x)
    jax.block_until_ready(y)
    assert y.shape == x.shape, (y.shape, x.shape)
    assert y.dtype == x.dtype, (y.dtype, x.dtype)
    assert bool(jnp.all(y == x)), "identity output mismatch"

    # Explicit copy path with default threshold: small array -> XLA native copy.
    y_small = identity(x, copy=True)
    jax.block_until_ready(y_small)
    assert y_small.shape == x.shape and y_small.dtype == x.dtype
    assert bool(jnp.all(y_small == x)), "small-copy identity output mismatch"

    # Force the Pallas HBM->HBM DMA kernel (threshold 0) to exercise it here.
    y_dma = identity(x, copy=True, min_pallas_copy_bytes=0)
    jax.block_until_ready(y_dma)
    assert y_dma.shape == x.shape, (y_dma.shape, x.shape)
    assert y_dma.dtype == x.dtype, (y_dma.dtype, x.dtype)
    assert bool(jnp.all(y_dma == x)), "DMA-copy identity output mismatch"

    print("KERNEL_OK")
</pallas_src>

<mosaic_0001>
module attributes {stable_mosaic.version = 11 : i64} {
  func.func @_single_dma_copy_kernel(%arg0: memref<2x4x16x16xf32, #tpu.memory_space<any>>, %arg1: memref<2x4x16x16xf32, #tpu.memory_space<any>>, %arg2: memref<!tpu.dma_semaphore, #tpu.memory_space<semaphore_mem>>) attributes {dimension_semantics = [], scalar_prefetch = 0 : i64, scratch_operands = 1 : i64, tpu.core_type = #tpu.core_type<tc>} {
    tpu.enqueue_dma source(%arg0 : memref<2x4x16x16xf32, #tpu.memory_space<any>>) target(%arg1 : memref<2x4x16x16xf32, #tpu.memory_space<any>>) target_semaphore(%arg2 : memref<!tpu.dma_semaphore, #tpu.memory_space<semaphore_mem>>)
    tpu.wait_dma2 semaphore(%arg2 : memref<!tpu.dma_semaphore, #tpu.memory_space<semaphore_mem>>) src(%arg0 : memref<2x4x16x16xf32, #tpu.memory_space<any>>) dst(%arg1 : memref<2x4x16x16xf32, #tpu.memory_space<any>>)
    return
  }
}

</mosaic_0001>

<bundles_post_ra>
// kernel: tpu_custom_call.1
= control target key start
LH: loop header
LB: loop body
LE: loop exit
PB: predicated region body
PF: predicated region fallthrough
CT: control target
= control target key end

     0   :  { %s30_s6 = smov [#allocation2]   ;;  %s31_s7 = smov 131072   ;;  %s49_s0 = inlined_call_operand.hbm [shape: f32[2,4,16,16], index: 0, kind: input, shape index: {}]   ;;  %s50_s1 = inlined_call_operand.hbm [shape: f32[2,4,16,16], index: 1, kind: output, shape index: {}]  }
   0x1   :  { %s32_s8 = smov 0  }
   0x2   :  { %12 = dma.general %s49_s0, 2048, %s50_s1, %s30_s6, %s31_s7, [#allocation4], %s32_s8, 0  }
   0x3   :  { %28 = dma.done.wait [#allocation2], 2048 }
   0x4   :  { %29 = vsyncadd [#allocation2], 4294965248 }
   0x5   :  { %18 = vsyncmov [#allocation2] }
   0x8   :  { %s19_s13 = vpop.sfrf %18 }
   0x9   :  { %p24_p0 = scmp.ne.s32.totalorder %s19_s13, 0 }
   0xb   :  { %23 = shalt.err (%p24_p0)  }

</bundles_post_ra>
